<compile_context>
chip_gen: v5e
topology: v5e:2x2
jax: 0.10.0
libtpu: 0.0.40
codegen_flags: <defaults>
</compile_context>

<pallas_src>
import jax
import jax.numpy as jnp
from jax import lax
from jax.experimental import pallas as pl
from jax.experimental.pallas import tpu as pltpu


def _round_up(n, m):
    return ((n + m - 1) // m) * m


def _qcritic_kernel(x_ref, w1_ref, b1_ref, w2_ref, b2_ref, w3_ref, b3_ref,
                    out_ref):
    # x_ref: (TN, K=23) f32 tile, batch-major straight from HBM.
    # Cast once to bf16 (VPU, cheap) -- the MXU inputs are bf16, accumulation f32.
    x = x_ref[...].astype(jnp.bfloat16)

    # Layer 1: (H, K) . (TN, K)^T -> (H, TN).  Contracting dim 1 of both
    # operands keeps the result feature-major (batch on the lane axis) without
    # a materialized transpose of the big x tile.
    h1 = lax.dot_general(
        w1_ref[...], x,
        dimension_numbers=(((1,), (1,)), ((), ())),
        preferred_element_type=jnp.float32)
    h1 = jnp.maximum(h1 + b1_ref[...], 0.0)                 # f32 bias + ReLU

    # Layer 2: (H, H) @ (H, TN) -> (H, TN); bf16 inputs, f32 accumulation.
    h2 = jnp.dot(w2_ref[...], h1.astype(jnp.bfloat16),
                 preferred_element_type=jnp.float32)
    h2 = jnp.maximum(h2 + b2_ref[...], 0.0)                 # f32 bias + ReLU

    # Head (H -> 1) on the VPU/XLU in f32: lane-broadcast multiply by w3 (H, 1)
    # and reduce over the sublane (H) axis.  Keeps the MXU free and the (1, TN)
    # result lane-dense, so the store is an unmasked vst on full tiles.
    y = jnp.sum(h2 * w3_ref[...], axis=0, keepdims=True) + b3_ref[...]
    out_ref[...] = y.astype(out_ref.dtype)


def half_cheetah_q_critic(x, w1, b1, w2, b2, w3, b3, *, tile_n=16384):
    """Forward pass.

    x: (B, 23) float32.
    Weights stored as (in_features, out_features); biases as (1, out_features).
    Returns (B, 1) float32, matching the PyTorch module (bf16 MXU inputs,
    f32 accumulation and f32 elementwise math).
    """
    B, K = x.shape
    H = w1.shape[1]

    # Batch tile on the lane axis:
    #   * multiple of 128 (lane width) -- also fixes user-supplied tile_n,
    #   * large (default up to 16K) to amortize ~0.35us per-grid-step overhead,
    #   * split so the grid has >= 2 tiles when B is large (v7x dual TC),
    #   * capped at 32768 so the VMEM budget stays under v7x's 64 MiB physical.
    half = _round_up(pl.cdiv(B, 2), 128)
    tn = _round_up(max(min(tile_n, half), 1), 128)
    tn = min(tn, 32768)
    n_tiles = pl.cdiv(B, tn)

    # Layout plumbing only (no HBM passes over x): weights transposed to
    # (out, in) and cast to bf16 for the MXU; biases to (out, 1) in f32.
    w1t = w1.T.astype(jnp.bfloat16)                       # (H, K)
    w2t = w2.T.astype(jnp.bfloat16)                       # (H, H)
    b1t = b1.reshape(H, 1).astype(jnp.float32)            # (H, 1)
    b2t = b2.reshape(H, 1).astype(jnp.float32)            # (H, 1)
    w3r = w3.reshape(H, 1).astype(jnp.float32)            # (H, 1) lane-broadcast factor
    b3r = b3.reshape(1, 1).astype(jnp.float32)            # (1, 1)

    # Weights/biases: whole-array blocks with constant index_maps -> resident
    # in VMEM across all grid steps (no re-DMA).
    const = lambda arr: pl.BlockSpec(arr.shape, lambda i: (0, 0))

    # Explicit VMEM budget: double-buffered x tile + double-buffered out tile
    # + generous allowance for the f32/bf16 activation temporaries + weights.
    vmem_budget = (
        2 * tn * K * 4            # 2x (tn, K) f32 x tiles
        + 2 * tn * 4              # 2x (1, tn) f32 out tiles
        + 8 * H * tn * 4          # h1/h2 f32 + bf16 casts (generous)
        + 4 * H * (K + H + 4) * 4
        + (2 << 20))              # headroom
    vmem_budget = int(min(max(vmem_budget, 8 << 20), 48 << 20))

    cost = pl.CostEstimate(
        flops=2 * B * (K * H + H * H + H),
        transcendentals=0,
        bytes_accessed=B * (K + 1) * 4 + (K * H + H * H) * 2 + (3 * H + 1) * 4,
    )

    out = pl.pallas_call(
        _qcritic_kernel,
        out_shape=jax.ShapeDtypeStruct((1, B), jnp.float32),
        grid=(n_tiles,),
        in_specs=[
            pl.BlockSpec((tn, K), lambda i: (i, 0)),      # x: pipelined batch tiles
            const(w1t), const(b1t),
            const(w2t), const(b2t),
            const(w3r), const(b3r),
        ],
        out_specs=pl.BlockSpec((1, tn), lambda i: (0, i)),  # lane-dense output
        compiler_params=pltpu.CompilerParams(
            dimension_semantics=("parallel",),            # megacore-shardable
            vmem_limit_bytes=vmem_budget),
        cost_estimate=cost,
    )(x, w1t, b1t, w2t, b2t, w3r, b3r)

    # (1, B) and (B, 1) share the same linear layout.
    return out.reshape(B, 1)


def init_params(key, hidden_dim):
    """Deterministic PyTorch-style init: U(-1/sqrt(fan_in), 1/sqrt(fan_in)).

    Weights stored as (in_features, out_features), biases as (1, out_features).
    """
    in_dim = 17 + 6
    dims = [(in_dim, hidden_dim), (hidden_dim, hidden_dim), (hidden_dim, 1)]
    params = []
    keys = jax.random.split(key, 2 * len(dims))
    for i, (din, dout) in enumerate(dims):
        bound = 1.0 / jnp.sqrt(jnp.float32(din))
        w = jax.random.uniform(keys[2 * i], (din, dout), jnp.float32,
                               -bound, bound)
        b = jax.random.uniform(keys[2 * i + 1], (1, dout), jnp.float32,
                               -bound, bound)
        params += [w, b]
    return params


def reference_forward(x, w1, b1, w2, b2, w3, b3):
    h1 = jnp.maximum(x @ w1 + b1, 0.0)
    h2 = jnp.maximum(h1 @ w2 + b2, 0.0)
    return h2 @ w3 + b3


def reference_forward_bf16(x, w1, b1, w2, b2, w3, b3):
    """Matches the kernel's mixed precision: bf16 dot inputs, f32 accumulation,
    f32 bias/ReLU/head math."""
    xb = x.astype(jnp.bfloat16)
    h1 = jnp.dot(xb, w1.astype(jnp.bfloat16),
                 preferred_element_type=jnp.float32) + b1
    h1 = jnp.maximum(h1, 0.0)
    h2 = jnp.dot(h1.astype(jnp.bfloat16), w2.astype(jnp.bfloat16),
                 preferred_element_type=jnp.float32) + b2
    h2 = jnp.maximum(h2, 0.0)
    return h2 @ w3 + b3


if __name__ == "__main__":
    hidden_dim = 32
    key = jax.random.PRNGKey(0)
    k_x, k_p = jax.random.split(key)
    w1, b1, w2, b2, w3, b3 = init_params(k_p, hidden_dim)

    # batch=8: single partial tile (tn=128).  batch=300: two tiles with a
    # ragged last tile -> exercises the multi-tile grid and edge-block masking.
    for batch in (8, 300):
        kx = jax.random.fold_in(k_x, batch)
        # Input: concatenated (state=17, action=6) -> (B, 23)
        x = jax.random.normal(kx, (batch, 17 + 6), dtype=jnp.float32)

        out = half_cheetah_q_critic(x, w1, b1, w2, b2, w3, b3)
        out = jax.block_until_ready(out)
        assert out.shape == (batch, 1)

        ref_mp = reference_forward_bf16(x, w1, b1, w2, b2, w3, b3)
        ref_f32 = reference_forward(x, w1, b1, w2, b2, w3, b3)
        assert jnp.allclose(out, ref_mp, atol=1e-3, rtol=1e-3), \
            "mismatch vs mixed-precision reference"
        assert jnp.allclose(out, ref_f32, atol=5e-2, rtol=5e-2), \
            "mismatch vs f32 reference"

    print("KERNEL_OK")
</pallas_src>

<mosaic_0001>
module attributes {stable_mosaic.version = 11 : i64} {
  func.func @_qcritic_kernel(%arg0: i32, %arg1: memref<128x23xf32, #tpu.memory_space<vmem>>, %arg2: memref<32x23xbf16, #tpu.memory_space<vmem>>, %arg3: memref<32x1xf32, #tpu.memory_space<vmem>>, %arg4: memref<32x32xbf16, #tpu.memory_space<vmem>>, %arg5: memref<32x1xf32, #tpu.memory_space<vmem>>, %arg6: memref<32x1xf32, #tpu.memory_space<vmem>>, %arg7: memref<1x1xf32, #tpu.memory_space<vmem>>, %arg8: memref<1x128xf32, #tpu.memory_space<vmem>>) attributes {dimension_semantics = [#tpu.dimension_semantics<parallel>], iteration_bounds = array<i64: 1>, scalar_prefetch = 0 : i64, scratch_operands = 0 : i64, tpu.core_type = #tpu.core_type<tc>, window_params = [{transform_indices = @transform_0, window_bounds = array<i64: 128, 23>}, {pipeline_mode = #tpu.pipeline_mode<synchronous>, transform_indices = @transform_1, window_bounds = array<i64: 32, 23>}, {pipeline_mode = #tpu.pipeline_mode<synchronous>, transform_indices = @transform_2, window_bounds = array<i64: 32, 1>}, {pipeline_mode = #tpu.pipeline_mode<synchronous>, transform_indices = @transform_3, window_bounds = array<i64: 32, 32>}, {pipeline_mode = #tpu.pipeline_mode<synchronous>, transform_indices = @transform_4, window_bounds = array<i64: 32, 1>}, {pipeline_mode = #tpu.pipeline_mode<synchronous>, transform_indices = @transform_5, window_bounds = array<i64: 32, 1>}, {pipeline_mode = #tpu.pipeline_mode<synchronous>, transform_indices = @transform_6, window_bounds = array<i64: 1, 1>}, {transform_indices = @transform_7, window_bounds = array<i64: 1, 128>}]} {
    %c0 = arith.constant 0 : index
    %c0_0 = arith.constant 0 : index
    %0 = vector.load %arg1[%c0, %c0_0] : memref<128x23xf32, #tpu.memory_space<vmem>>, vector<128x23xf32>
    %1 = arith.truncf %0 : vector<128x23xf32> to vector<128x23xbf16>
    %c0_1 = arith.constant 0 : index
    %c0_2 = arith.constant 0 : index
    %2 = vector.load %arg2[%c0_1, %c0_2] : memref<32x23xbf16, #tpu.memory_space<vmem>>, vector<32x23xbf16>
    %cst = arith.constant dense<0.000000e+00> : vector<32x128xf32>
    %3 = tpu.matmul %2, %1, %cst {dimension_numbers = #tpu.dot_dimension_numbers<[1], [1], [0], [0], [0, 0, 1, 0], [], []>} : vector<32x23xbf16>, vector<128x23xbf16>, vector<32x128xf32> -> vector<32x128xf32>
    %c0_3 = arith.constant 0 : index
    %c0_4 = arith.constant 0 : index
    %4 = vector.load %arg3[%c0_3, %c0_4] : memref<32x1xf32, #tpu.memory_space<vmem>>, vector<32x1xf32>
    %5 = vector.broadcast %4 : vector<32x1xf32> to vector<32x128xf32>
    %6 = arith.addf %3, %5 : vector<32x128xf32>
    %cst_5 = arith.constant 0.000000e+00 : f32
    %7 = vector.broadcast %cst_5 : f32 to vector<32x128xf32>
    %8 = arith.maximumf %6, %7 : vector<32x128xf32>
    %c0_6 = arith.constant 0 : index
    %c0_7 = arith.constant 0 : index
    %9 = vector.load %arg4[%c0_6, %c0_7] : memref<32x32xbf16, #tpu.memory_space<vmem>>, vector<32x32xbf16>
    %10 = arith.truncf %8 : vector<32x128xf32> to vector<32x128xbf16>
    %cst_8 = arith.constant dense<0.000000e+00> : vector<32x128xf32>
    %11 = tpu.matmul %9, %10, %cst_8 {dimension_numbers = #tpu.dot_dimension_numbers<[1], [0], [0], [1], [0, 0, 1, 1], [], []>} : vector<32x32xbf16>, vector<32x128xbf16>, vector<32x128xf32> -> vector<32x128xf32>
    %c0_9 = arith.constant 0 : index
    %c0_10 = arith.constant 0 : index
    %12 = vector.load %arg5[%c0_9, %c0_10] : memref<32x1xf32, #tpu.memory_space<vmem>>, vector<32x1xf32>
    %13 = vector.broadcast %12 : vector<32x1xf32> to vector<32x128xf32>
    %14 = arith.addf %11, %13 : vector<32x128xf32>
    %cst_11 = arith.constant 0.000000e+00 : f32
    %15 = vector.broadcast %cst_11 : f32 to vector<32x128xf32>
    %16 = arith.maximumf %14, %15 : vector<32x128xf32>
    %c0_12 = arith.constant 0 : index
    %c0_13 = arith.constant 0 : index
    %17 = vector.load %arg6[%c0_12, %c0_13] : memref<32x1xf32, #tpu.memory_space<vmem>>, vector<32x1xf32>
    %18 = vector.broadcast %17 : vector<32x1xf32> to vector<32x128xf32>
    %19 = arith.mulf %16, %18 : vector<32x128xf32>
    %cst_14 = arith.constant dense<0.000000e+00> : vector<128xf32>
    %20 = vector.multi_reduction <add>, %19, %cst_14 [0] : vector<32x128xf32> to vector<128xf32>
    %21 = vector.shape_cast %20 : vector<128xf32> to vector<1x128xf32>
    %c0_15 = arith.constant 0 : index
    %c0_16 = arith.constant 0 : index
    %22 = vector.load %arg7[%c0_15, %c0_16] : memref<1x1xf32, #tpu.memory_space<vmem>>, vector<1x1xf32>
    %23 = vector.broadcast %22 : vector<1x1xf32> to vector<1x128xf32>
    %24 = arith.addf %21, %23 : vector<1x128xf32>
    %c0_17 = arith.constant 0 : index
    %c0_18 = arith.constant 0 : index
    %25 = vector.load %arg8[%c0_17, %c0_18] : memref<1x128xf32, #tpu.memory_space<vmem>>, vector<1x128xf32>
    tpu.vector_store %arg8[%c0_17, %c0_18], %24 {strides = array<i32>} : memref<1x128xf32, #tpu.memory_space<vmem>>, vector<1x128xf32>,
    return
  }
  func.func @transform_0(%arg0: i32) -> (i32, i32) {
    %c0_i32 = arith.constant 0 : i32
    %c0_i32_0 = arith.constant 0 : i32
    return %arg0, %c0_i32 : i32, i32
  }
  func.func @transform_1(%arg0: i32) -> (i32, i32) {
    %c0_i32 = arith.constant 0 : i32
    %c0_i32_0 = arith.constant 0 : i32
    %c0_i32_1 = arith.constant 0 : i32
    return %c0_i32, %c0_i32_0 : i32, i32
  }
  func.func @transform_2(%arg0: i32) -> (i32, i32) {
    %c0_i32 = arith.constant 0 : i32
    %c0_i32_0 = arith.constant 0 : i32
    %c0_i32_1 = arith.constant 0 : i32
    return %c0_i32, %c0_i32_0 : i32, i32
  }
  func.func @transform_3(%arg0: i32) -> (i32, i32) {
    %c0_i32 = arith.constant 0 : i32
    %c0_i32_0 = arith.constant 0 : i32
    %c0_i32_1 = arith.constant 0 : i32
    return %c0_i32, %c0_i32_0 : i32, i32
  }
  func.func @transform_4(%arg0: i32) -> (i32, i32) {
    %c0_i32 = arith.constant 0 : i32
    %c0_i32_0 = arith.constant 0 : i32
    %c0_i32_1 = arith.constant 0 : i32
    return %c0_i32, %c0_i32_0 : i32, i32
  }
  func.func @transform_5(%arg0: i32) -> (i32, i32) {
    %c0_i32 = arith.constant 0 : i32
    %c0_i32_0 = arith.constant 0 : i32
    %c0_i32_1 = arith.constant 0 : i32
    return %c0_i32, %c0_i32_0 : i32, i32
  }
  func.func @transform_6(%arg0: i32) -> (i32, i32) {
    %c0_i32 = arith.constant 0 : i32
    %c0_i32_0 = arith.constant 0 : i32
    %c0_i32_1 = arith.constant 0 : i32
    return %c0_i32, %c0_i32_0 : i32, i32
  }
  func.func @transform_7(%arg0: i32) -> (i32, i32) {
    %c0_i32 = arith.constant 0 : i32
    %c0_i32_0 = arith.constant 0 : i32
    return %c0_i32, %arg0 : i32, i32
  }
}

</mosaic_0001>

<bundles_post_ra>
// kernel: tpu_custom_call.1
= control target key start
LH: loop header
LB: loop body
LE: loop exit
PB: predicated region body
PF: predicated region fallthrough
CT: control target
= control target key end

     0   :  { %s495_s0 = inlined_call_operand.vmem [shape: f32[8,23], index: 0, kind: input, shape index: {}]   ;;  %s496_s1 = inlined_call_operand.vmem [shape: bf16[32,23], index: 1, kind: input, shape index: {}]   ;;  %s497_s2 = inlined_call_operand.vmem [shape: f32[32,1], index: 2, kind: input, shape index: {}]   ;;  %s498_s3 = inlined_call_operand.vmem [shape: bf16[32,32], index: 3, kind: input, shape index: {}]   ;;  %s499_s4 = inlined_call_operand.vmem [shape: f32[32,1], index: 4, kind: input, shape index: {}]   ;;  %s500_s5 = inlined_call_operand.vmem [shape: f32[32,1], index: 5, kind: input, shape index: {}]   ;;  %s501_s6 = inlined_call_operand.<no memory space> [shape: f32[1,1], index: 6, kind: input, shape index: {}]   ;;  %s502_s7 = inlined_call_operand.hbm [shape: f32[1,8], index: 7, kind: output, shape index: {}]  }
   0x1   :  { %v12_v0 = vstv %s501_s6 }
   0x2   :  { %13 = vst [vmem:[#allocation2] sm:$0x1] %v12_v0 }
   0x3   :  { %v44_v1 = vld [vmem:[%s495_s0 + $0x70] sm:$0xff]  ;;  %v45_v2 = vld [vmem:[%s495_s0 + $0x78] sm:$0xff]  ;;  %vm92_vm0 = vcmask 187392   ;;  %v42_v4 = vld [vmem:[%s495_s0 + $0x60] sm:$0xff] }
   0x4   :  { %v53_v3 = vpack.c.bf16 %v45_v2, %v44_v1  ;;  %v43_v5 = vld [vmem:[%s495_s0 + $0x68] sm:$0xff] }
   0x6   :  { %v121_v6 = vsel %vm92_vm0, %v53_v3, 0 }
   0x7   :  { %14 = vsyncpa [#allocation4], 0  ;;  %302 = vmatpush.bf16.xpose.msra.mxu2 %v121_v6  ;;  %123 = vmatpush.bf16.xpose.msra.mxu0 %v121_v6  ;;  %v52_v7 = vpack.c.bf16 %v43_v5, %v42_v4  ;;  %v40_v9 = vld [vmem:[%s495_s0 + $0x50] sm:$0xff]  ;;  %v41_v10 = vld [vmem:[%s495_s0 + $0x58] sm:$0xff]  ;;  %v341_v13 = vmov 0   ;;  %vm186_vm1 = vcmask 261120  }
   0x8   :  { %v60_v11 = vld [vmem:[%s497_s2 + $0x10] sm:$0xff]  ;;  %v51_v12 = vpack.c.bf16 %v41_v10, %v40_v9  ;;  %312 = vset.pattern.permute.xlu0 %v341_v13  ;;  %313 = vset.pattern.permute.xlu1 %v341_v13  ;;  %v38_v15 = vld [vmem:[%s495_s0 + $0x40] sm:$0xff]  ;;  %v39_v16 = vld [vmem:[%s495_s0 + $0x48] sm:$0xff]  ;;  %s269_s16 = sshll.u32 %s502_s7, 4  ;;  %s270_s16 = int_to_ptr.hbm [resolvable:$true] %s269_s16 }
   0x9   :  { %v118_v8 = vsel %vm92_vm0, %v52_v7, 0  ;;  %74 = vperm.xlu0 %312, %v60_v11   ;;  %314 = vset.pattern.permute.xlu2 %v341_v13  ;;  %v61_v17 = vld [vmem:[%s497_s2 + $0x18] sm:$0xff]  ;;  %v50_v18 = vpack.c.bf16 %v39_v16, %v38_v15  ;;  %v36_v20 = vld [vmem:[%s495_s0 + $0x30] sm:$0xff]  ;;  %v58_v22 = vld [vmem:[%s497_s2] sm:$0xff] }
   0xa   :  { %v115_v14 = vsel %vm92_vm0, %v51_v12, 0  ;;  %v37_v21 = vld [vmem:[%s495_s0 + $0x38] sm:$0xff]  ;;  %64 = vperm.xlu1 %313, %v58_v22   ;;  %v34_v25 = vld [vmem:[%s495_s0 + $0x20] sm:$0xff]  ;;  %v35_v26 = vld [vmem:[%s495_s0 + $0x28] sm:$0xff] }
   0xb   :  { %v112_v19 = vsel %vm92_vm0, %v50_v18, 0  ;;  %v49_v23 = vpack.c.bf16 %v37_v21, %v36_v20  ;;  %v154_v27 = vld [vmem:[%s499_s4 + $0x10] sm:$0xff]  ;;  %v59_v28 = vld [vmem:[%s497_s2 + $0x8] sm:$0xff]  ;;  %v48_v29 = vpack.c.bf16 %v35_v26, %v34_v25  ;;  %v33_v32 = vld [vmem:[%s495_s0 + $0x18] sm:$0xff] }
   0xc   :  { %v32_v31 = vld [vmem:[%s495_s0 + $0x10] sm:$0xff]  ;;  %v217_v33 = vld [vmem:[%s500_s5 + $0x8] sm:$0xff]  ;;  %v155_v34 = vld [vmem:[%s499_s4 + $0x18] sm:$0xff] }
   0xd   :  { %v109_v24 = vsel %vm92_vm0, %v49_v23, 0  ;;  %v106_v30 = vsel %vm92_vm0, %v48_v29, 0  ;;  %v47_v35 = vpack.c.bf16 %v33_v32, %v32_v31  ;;  %v30_v37 = vld [vmem:[%s495_s0] sm:$0xff]  ;;  %v31_v38 = vld [vmem:[%s495_s0 + $0x8] sm:$0xff]  ;;  %v218_v40 = vld [vmem:[%s500_s5 + $0x10] sm:$0xff] }
   0xe   :  { %v253_v39 = vld [vmem:[#allocation2] sm:$0x1]  ;;  %v46_v41 = vpack.c.bf16 %v31_v38, %v30_v37  ;;  %v299_v43 = vld [vmem:[%s496_s1 + $0x8] sm:$0xff]  ;;  %v219_v3 = vld [vmem:[%s500_s5 + $0x18] sm:$0xff] }
   0xf   :  { %303 = vmatpush.bf16.xpose.msra.mxu2 %v118_v8  ;;  %124 = vmatpush.bf16.xpose.msra.mxu0 %v118_v8  ;;  %v103_v36 = vsel %vm92_vm0, %v47_v35, 0  ;;  %v298_v44 = vld [vmem:[%s496_s1] sm:$0xff]  ;;  %v153_v51 = vld [vmem:[%s499_s4 + $0x8] sm:$0xff] }
  0x10   :  { %v100_v42 = vsel %vm92_vm0, %v46_v41, 0  ;;  %v152_v45 = vld [vmem:[%s499_s4] sm:$0xff]  ;;  %v301_v4 = vld [vmem:[%s498_s3 + $0x8] sm:$0xff] }
  0x11   :  { %79 = vperm.xlu0 %312, %v61_v17   ;;  %158 = vperm.xlu2 %314, %v152_v45   ;;  %v216_v61 = vld [vmem:[%s500_s5] sm:$0xff] }
  0x12   :  { %69 = vperm.xlu1 %313, %v59_v28   ;;  %v300_v2 = vld [vmem:[%s498_s3] sm:$0xff]  ;;  %s342_s3 = smov [#allocation3]  }
  0x13   :  { %s267_s5 = sshll.u32 %s342_s3, 4  ;;  %s268_s5 = int_to_ptr.vmem [resolvable:$true] %s267_s5 }
  0x17   :  { %304 = vmatpush.bf16.xpose.msra.mxu2 %v115_v14  ;;  %125 = vmatpush.bf16.xpose.msra.mxu0 %v115_v14 }
  0x19   :  { %168 = vperm.xlu0 %312, %v154_v27   ;;  %163 = vperm.xlu2 %314, %v153_v51  }
  0x1a   :  { %173 = vperm.xlu1 %313, %v155_v34  }
  0x1f   :  { %305 = vmatpush.bf16.xpose.msra.mxu2 %v112_v19  ;;  %126 = vmatpush.bf16.xpose.msra.mxu0 %v112_v19 }
  0x21   :  { %227 = vperm.xlu0 %312, %v217_v33   ;;  %222 = vperm.xlu2 %314, %v216_v61  }
  0x22   :  { %232 = vperm.xlu1 %313, %v218_v40  }
  0x27   :  { %306 = vmatpush.bf16.xpose.msra.mxu2 %v109_v24  ;;  %127 = vmatpush.bf16.xpose.msra.mxu0 %v109_v24 }
  0x29   :  { %256 = vperm.xlu0 %312, %v253_v39   ;;  %237 = vperm.xlu2 %314, %v219_v3  }
  0x2f   :  { %307 = vmatpush.bf16.xpose.msra.mxu2 %v106_v30  ;;  %128 = vmatpush.bf16.xpose.msra.mxu0 %v106_v30 }
  0x37   :  { %308 = vmatpush.bf16.xpose.msra.mxu2 %v103_v36  ;;  %129 = vmatpush.bf16.xpose.msra.mxu0 %v103_v36 }
  0x3f   :  { %309 = vmatpush.bf16.xpose.msra.mxu2 %v100_v42  ;;  %130 = vmatpush.bf16.xpose.msra.mxu0 %v100_v42 }
  0x46   :  { %287 = vmatmul.msk.bf16.vlgmr.msra.gmra.mxu2 %vm92_vm0, %v299_v43  ;;  %286 = vmatmul.msk.bf16.vlgmr.msra.gmra.mxu0 %vm92_vm0, %v298_v44 }
  0x6b   :  { %v159_v5 = vpop.permute.xlu2 %158 }
  0x73   :  { %v164_v7 = vpop.permute.xlu2 %163 }
  0x7b   :  { %v75_v47 = vpop.permute.xlu0 %74  ;;  %v223_v15 = vpop.permute.xlu2 %222 }
  0x7c   :  { %v65_v48 = vpop.permute.xlu1 %64 }
  0x83   :  { %v80_v52 = vpop.permute.xlu0 %79  ;;  %v238_v28 = vpop.permute.xlu2 %237 }
  0x84   :  { %v70_v54 = vpop.permute.xlu1 %69 }
  0x8b   :  { %v169_v9 = vpop.permute.xlu0 %168 }
  0x8c   :  { %v174_v10 = vpop.permute.xlu1 %173 }
  0x93   :  { %v228_v19 = vpop.permute.xlu0 %227 }
  0x94   :  { %v233_v21 = vpop.permute.xlu1 %232 }
  0x9b   :  { %v257_v36 = vpop.permute.xlu0 %256 }
  0x9c   :  { %v259_v38 = vperm.slane %v257_v36, 0 }
  0xc3   :  { %v132_v46 = vpop.f32.mrf.mxu0 }
  0xc4   :  { %v133_v56 = vadd.f32 %v132_v46, %v65_v48 }
  0xc6   :  { %v142_v62 = vmax.f32 %v133_v56, 0.0 }
  0xc9   :  { %v137_v49 = vpop.f32.mrf.mxu2 }
  0xca   :  { %v138_v53 = vadd.f32 %v137_v49, %v75_v47 }
  0xcb   :  { %v134_v50 = vpop.f32.mrf.mxu0 }
  0xcc   :  { %v135_v57 = vadd.f32 %v134_v50, %v70_v54  ;;  %v144_v59 = vmax.f32 %v138_v53, 0.0 }
  0xce   :  { %v143_v63 = vmax.f32 %v135_v57, 0.0 }
  0xd0   :  { %v150_v1 = vpack.c.bf16 %v143_v63, %v142_v62 }
  0xd1   :  { %v139_v55 = vpop.f32.mrf.mxu2 }
  0xd2   :  { %v140_v58 = vadd.f32 %v139_v55, %v80_v52 }
  0xd4   :  { %v145_v60 = vmax.f32 %v140_v58, 0.0 }
  0xd6   :  { %v151_v0 = vpack.c.bf16 %v145_v60, %v144_v59 }
  0xd8   :  { %199 = vmatpush.bf16.msra.mxu1 %v151_v0 }
  0xdc   :  { %200 = vmatpush.bf16.msra.mxu1 %v150_v1 }
  0xdf   :  { %296 = vmatmul.msk.bf16.vlgmr.msra.gmra.mxu1 %vm186_vm1, %v300_v2 }
  0xef   :  { %297 = vmatmul.msk.bf16.gmra.mxu1 %vm186_vm1, %v301_v4 }
 0x15c   :  { %v202_v6 = vpop.f32.mrf.mxu1 }
 0x15d   :  { %v203_v13 = vadd.f32 %v202_v6, %v159_v5 }
 0x15f   :  { %v212_v17 = vmax.f32 %v203_v13, 0.0 }
 0x161   :  { %v240_v23 = vmul.f32 %v223_v15, %v212_v17 }
 0x164   :  { %v204_v8 = vpop.f32.mrf.mxu1 }
 0x165   :  { %v205_v11 = vadd.f32 %v204_v8, %v164_v7 }
 0x167   :  { %v213_v16 = vmax.f32 %v205_v11, 0.0 }
 0x169   :  { %v241_v20 = vmul.f32 %v228_v19, %v213_v16 }
 0x16b   :  { %v244_v26 = vadd.f32 %v241_v20, %v240_v23 }
 0x16c   :  { %v207_v12 = vpop.f32.mrf.mxu1 }
 0x16d   :  { %v208_v14 = vadd.f32 %v207_v12, %v169_v9 }
 0x16f   :  { %v214_v18 = vmax.f32 %v208_v14, 0.0 }
 0x171   :  { %v242_v24 = vmul.f32 %v233_v21, %v214_v18 }
 0x173   :  { %v245_v29 = vadd.f32 %v244_v26, %v242_v24 }
 0x174   :  { %v209_v22 = vpop.f32.mrf.mxu1 }
 0x175   :  { %v210_v25 = vadd.f32 %v209_v22, %v174_v10 }
 0x177   :  { %v215_v27 = vmax.f32 %v210_v25, 0.0 }
 0x179   :  { %v243_v30 = vmul.f32 %v238_v28, %v215_v27 }
 0x17b   :  { %v246_v31 = vadd.f32 %v245_v29, %v243_v30 }
 0x17d   :  { %v247_v32 = vrot.slane %v246_v31, 4 }
 0x17f   :  { %v248_v33 = vadd.f32 %v247_v32, %v246_v31 }
 0x181   :  { %v249_v34 = vrot.slane %v248_v33, 2 }
 0x183   :  { %v250_v35 = vadd.f32 %v249_v34, %v248_v33 }
 0x185   :  { %v251_v37 = vrot.slane %v250_v35, 1 }
 0x187   :  { %v252_v39 = vadd.f32 %v251_v37, %v250_v35 }
 0x189   :  { %v260_v40 = vadd.f32 %v259_v38, %v252_v39 }
 0x18b   :  { %261 = vst [vmem:[#allocation3] sm:$0x1] %v260_v40 }
 0x18c   :  { %272 = dma.vmem_to_hbm [thread:$0]  %s268_s5, 16, %s270_s16, [#allocation4]  }
 0x18d   :  { %339 = dma.done.wait [#allocation4], 16  }
 0x18e   :  { %340 = vsyncadd [#allocation4], 4294967280 }
 0x18f   :  { %277 = vsyncpa [#allocation4], 1 }

</bundles_post_ra>
